<compile_context>
chip_gen: v6e
topology: v6e:2x2x1
jax: 0.10.0
libtpu: 0.0.40
codegen_flags: <defaults>
</compile_context>

<pallas_src>
import functools

import jax
import jax.numpy as jnp
from jax.experimental import pallas as pl
from jax.experimental.pallas import tpu as pltpu


def _round_up(x, m):
    return ((x + m - 1) // m) * m


def _choose_tiles(B, N, max_rows):
    """Pick (TB, TN): TB batches x TN points per grid step, TB*TN <= max_rows."""
    max_rows = max(8, _round_up(max_rows, 8))
    if N >= max_rows:
        return 1, max_rows
    tn = _round_up(N, 8)
    tb = max(1, min(B, max_rows // tn))
    return tb, tn


def _lidar_kernel(x_ref, w1_ref, b1_ref, w2_ref, b2_ref, w3_ref, b3_ref,
                  o_ref, acc_ref, *, tn, n_points, needs_mask, compute_dtype):
    # x_ref: (TB, TN, 4) f32; weights: (in, out); biases: (1, out) f32
    # o_ref: (TB, 1, 512) f32; acc_ref: (TB, 512) f32 scratch.
    ni = pl.program_id(1)

    @pl.when(ni == 0)
    def _init():
        acc_ref[...] = jnp.zeros_like(acc_ref)

    tb = x_ref.shape[0]
    m = tb * tn
    x = x_ref[...].reshape(m, 4)                      # (M, 4) f32

    # ---- fc1: K = 4 -> four rank-1 VPU FMAs (avoids a lane-sparse MXU dot).
    h1 = x[:, 0:1] * w1_ref[0:1, :]
    for k in range(1, 4):
        h1 = h1 + x[:, k:k + 1] * w1_ref[k:k + 1, :]
    h1 = jnp.maximum(h1 + b1_ref[...], 0.0)           # (M, 128) f32

    # ---- fc2 / fc3 on the MXU (bf16-capable inputs, f32 accumulation).
    h2 = jnp.dot(h1.astype(compute_dtype), w2_ref[...],
                 preferred_element_type=jnp.float32) + b2_ref[...]
    h2 = jnp.maximum(h2, 0.0)                          # (M, 256) f32
    h3 = jnp.dot(h2.astype(compute_dtype), w3_ref[...],
                 preferred_element_type=jnp.float32) + b3_ref[...]
    h3 = jnp.maximum(h3, 0.0)                          # (M, 512) f32

    h3 = h3.reshape(tb, tn, 512)
    if needs_mask:
        # Zero contributions from zero-padded point rows (ReLU(b) != 0).
        pidx = ni * tn + jax.lax.broadcasted_iota(jnp.int32, (1, tn, 1), 1)
        h3 = h3 * (pidx < n_points).astype(h3.dtype)

    acc_ref[...] += jnp.sum(h3, axis=1)                # (TB, 512)

    @pl.when(ni == pl.num_programs(1) - 1)
    def _finalize():
        inv_n = 1.0 / float(n_points)                  # true N, not padded
        o_ref[...] = (acc_ref[...] * inv_n).reshape(tb, 1, 512)


def lidar_feature_extractor(x, params, *, compute_dtype=jnp.float32,
                            max_rows_per_step=2048):
    """x: (B, ...) reshaped to (B, N, 4). Returns (B, 512) float32.

    max_rows_per_step bounds TB*TN (rows fed to the MXU per grid step).
    2048 rows ~ 7 MB of f32 activations: safe under v7x's 64 MiB VMEM and the
    default scoped limits; on v6e (128 MiB) it can be raised to 4096-8192.
    """
    B = x.shape[0]
    x = x.reshape(B, -1, 4).astype(jnp.float32)
    N = x.shape[1]

    w1, b1, w2, b2, w3, b3 = params
    w1 = w1.astype(jnp.float32)                 # fc1 runs on the VPU in f32
    w2 = w2.astype(compute_dtype)               # MXU dots: optionally bf16
    w3 = w3.astype(compute_dtype)
    b1 = b1.reshape(1, 128).astype(jnp.float32)
    b2 = b2.reshape(1, 256).astype(jnp.float32)
    b3 = b3.reshape(1, 512).astype(jnp.float32)

    tb, tn = _choose_tiles(B, N, max_rows_per_step)
    n_pad = _round_up(N, tn)
    b_pad = _round_up(B, tb)
    if (b_pad, n_pad) != (B, N):
        x = jnp.pad(x, ((0, b_pad - B), (0, n_pad - N), (0, 0)))

    grid = (b_pad // tb, n_pad // tn)
    kernel = functools.partial(
        _lidar_kernel, tn=tn, n_points=N,
        needs_mask=(n_pad != N), compute_dtype=compute_dtype)

    out = pl.pallas_call(
        kernel,
        out_shape=jax.ShapeDtypeStruct((b_pad, 1, 512), jnp.float32),
        grid_spec=pltpu.PrefetchScalarGridSpec(
            num_scalar_prefetch=0,
            grid=grid,
            in_specs=[
                pl.BlockSpec((tb, tn, 4), lambda bi, ni: (bi, ni, 0)),  # x
                pl.BlockSpec((4, 128), lambda bi, ni: (0, 0)),          # W1
                pl.BlockSpec((1, 128), lambda bi, ni: (0, 0)),          # b1
                pl.BlockSpec((128, 256), lambda bi, ni: (0, 0)),        # W2
                pl.BlockSpec((1, 256), lambda bi, ni: (0, 0)),          # b2
                pl.BlockSpec((256, 512), lambda bi, ni: (0, 0)),        # W3
                pl.BlockSpec((1, 512), lambda bi, ni: (0, 0)),          # b3
            ],
            # Output block is resident across the point-tile (reduction) axis.
            out_specs=pl.BlockSpec((tb, 1, 512), lambda bi, ni: (bi, 0, 0)),
            scratch_shapes=[pltpu.VMEM((tb, 512), jnp.float32)],
        ),
        compiler_params=pltpu.CompilerParams(
            dimension_semantics=("parallel", "arbitrary"),
            vmem_limit_bytes=40 * 1024 * 1024,
        ),
    )(x, w1, b1, w2, b2, w3, b3)

    return out.reshape(b_pad, 512)[:B]


def init_params(key):
    """Deterministic synthetic params; weights stored as (in, out)."""
    ks = jax.random.split(key, 6)
    w1 = jax.random.normal(ks[0], (4, 128), jnp.float32) * 0.1
    b1 = jax.random.normal(ks[1], (128,), jnp.float32) * 0.1
    w2 = jax.random.normal(ks[2], (128, 256), jnp.float32) * 0.05
    b2 = jax.random.normal(ks[3], (256,), jnp.float32) * 0.05
    w3 = jax.random.normal(ks[4], (256, 512), jnp.float32) * 0.02
    b3 = jax.random.normal(ks[5], (512,), jnp.float32) * 0.02
    return (w1, b1, w2, b2, w3, b3)


def _reference(x, params):
    """Pure-JAX reference mirroring the PyTorch forward (true f32 matmuls)."""
    w1, b1, w2, b2, w3, b3 = params
    B = x.shape[0]
    x = x.reshape(B, -1, 4).astype(jnp.float32)
    hp = jax.lax.Precision.HIGHEST
    h = jax.nn.relu(jnp.dot(x, w1, precision=hp) + b1)
    h = jax.nn.relu(jnp.dot(h, w2, precision=hp) + b2)
    h = jax.nn.relu(jnp.dot(h, w3, precision=hp) + b3)
    return h.mean(axis=1)


if __name__ == "__main__":
    key = jax.random.PRNGKey(0)
    kx1, kx2, kp = jax.random.split(key, 3)
    params = init_params(kp)

    # Test 1: tiny point cloud -> batches packed into a single grid step.
    B1, N1 = 2, 8
    x1 = jax.random.normal(kx1, (B1, N1, 4), jnp.float32)
    out1 = jax.block_until_ready(lidar_feature_extractor(x1, params))
    ref1 = _reference(x1, params)
    assert out1.shape == (B1, 512), out1.shape
    assert jnp.allclose(out1, ref1, atol=1e-4, rtol=1e-4), "f32 mismatch (test 1)"

    # Test 2: N not a multiple of the point tile -> exercises the tiled
    # reduction, the resident VMEM accumulator and padded-row masking.
    B2, N2 = 3, 37
    x2 = jax.random.normal(kx2, (B2, N2, 4), jnp.float32)
    out2 = jax.block_until_ready(
        lidar_feature_extractor(x2, params, max_rows_per_step=16))
    ref2 = _reference(x2, params)
    assert out2.shape == (B2, 512), out2.shape
    assert jnp.allclose(out2, ref2, atol=1e-4, rtol=1e-4), "f32 mismatch (test 2)"

    # Test 3: bf16 MXU path for fc2/fc3 (f32 accumulation) -> relaxed tolerance.
    out3 = jax.block_until_ready(
        lidar_feature_extractor(x1, params, compute_dtype=jnp.bfloat16))
    assert out3.shape == (B1, 512), out3.shape
    assert float(jnp.max(jnp.abs(out3 - ref1))) < 5e-3, "bf16 mismatch (test 3)"

    print("KERNEL_OK")
</pallas_src>

<mosaic_0001>
module attributes {stable_mosaic.version = 11 : i64} {
  func.func @_lidar_kernel(%arg0: i32, %arg1: i32, %arg2: memref<2x8x4xf32, #tpu.memory_space<vmem>>, %arg3: memref<4x128xf32, #tpu.memory_space<vmem>>, %arg4: memref<1x128xf32, #tpu.memory_space<vmem>>, %arg5: memref<128x256xf32, #tpu.memory_space<vmem>>, %arg6: memref<1x256xf32, #tpu.memory_space<vmem>>, %arg7: memref<256x512xf32, #tpu.memory_space<vmem>>, %arg8: memref<1x512xf32, #tpu.memory_space<vmem>>, %arg9: memref<2x1x512xf32, #tpu.memory_space<vmem>>, %arg10: memref<2x512xf32, #tpu.memory_space<vmem>>) attributes {dimension_semantics = [#tpu.dimension_semantics<parallel>, #tpu.dimension_semantics<arbitrary>], iteration_bounds = array<i64: 1, 1>, scalar_prefetch = 0 : i64, scratch_operands = 1 : i64, tpu.core_type = #tpu.core_type<tc>, window_params = [{transform_indices = @transform_0, window_bounds = array<i64: 2, 8, 4>}, {pipeline_mode = #tpu.pipeline_mode<synchronous>, transform_indices = @transform_1, window_bounds = array<i64: 4, 128>}, {pipeline_mode = #tpu.pipeline_mode<synchronous>, transform_indices = @transform_2, window_bounds = array<i64: 1, 128>}, {pipeline_mode = #tpu.pipeline_mode<synchronous>, transform_indices = @transform_3, window_bounds = array<i64: 128, 256>}, {pipeline_mode = #tpu.pipeline_mode<synchronous>, transform_indices = @transform_4, window_bounds = array<i64: 1, 256>}, {pipeline_mode = #tpu.pipeline_mode<synchronous>, transform_indices = @transform_5, window_bounds = array<i64: 256, 512>}, {pipeline_mode = #tpu.pipeline_mode<synchronous>, transform_indices = @transform_6, window_bounds = array<i64: 1, 512>}, {transform_indices = @transform_7, window_bounds = array<i64: 2, 1, 512>}]} {
    %c0_i32 = arith.constant 0 : i32
    %0 = arith.cmpi eq, %arg1, %c0_i32 : i32
    %1 = arith.extui %0 : i1 to i32
    %c0_i32_0 = arith.constant 0 : i32
    %2 = arith.cmpi ne, %1, %c0_i32_0 : i32
    scf.if %2 {
      %cst_29 = arith.constant 0.000000e+00 : f32
      %55 = vector.broadcast %cst_29 : f32 to vector<2x512xf32>
      %c0_30 = arith.constant 0 : index
      %c0_31 = arith.constant 0 : index
      %56 = vector.load %arg10[%c0_30, %c0_31] : memref<2x512xf32, #tpu.memory_space<vmem>>, vector<2x512xf32>
      tpu.vector_store %arg10[%c0_30, %c0_31], %55 {strides = array<i32>} : memref<2x512xf32, #tpu.memory_space<vmem>>, vector<2x512xf32>,
    } else {
    }
    %c0 = arith.constant 0 : index
    %c0_1 = arith.constant 0 : index
    %c0_2 = arith.constant 0 : index
    %3 = vector.load %arg2[%c0, %c0_1, %c0_2] : memref<2x8x4xf32, #tpu.memory_space<vmem>>, vector<2x8x4xf32>
    %4 = vector.shape_cast %3 : vector<2x8x4xf32> to vector<16x4xf32>
    %5 = vector.extract_strided_slice %4 {offsets = [0, 0], sizes = [16, 1], strides = [1, 1]} : vector<16x4xf32> to vector<16x1xf32>
    %c0_3 = arith.constant 0 : index
    %c0_4 = arith.constant 0 : index
    %6 = vector.load %arg3[%c0_3, %c0_4] : memref<4x128xf32, #tpu.memory_space<vmem>>, vector<1x128xf32>
    %7 = vector.broadcast %5 : vector<16x1xf32> to vector<16x128xf32>
    %8 = vector.broadcast %6 : vector<1x128xf32> to vector<16x128xf32>
    %9 = arith.mulf %7, %8 : vector<16x128xf32>
    %10 = vector.extract_strided_slice %4 {offsets = [0, 1], sizes = [16, 1], strides = [1, 1]} : vector<16x4xf32> to vector<16x1xf32>
    %c1 = arith.constant 1 : index
    %c0_5 = arith.constant 0 : index
    %11 = vector.load %arg3[%c1, %c0_5] : memref<4x128xf32, #tpu.memory_space<vmem>>, vector<1x128xf32>
    %12 = vector.broadcast %10 : vector<16x1xf32> to vector<16x128xf32>
    %13 = vector.broadcast %11 : vector<1x128xf32> to vector<16x128xf32>
    %14 = arith.mulf %12, %13 : vector<16x128xf32>
    %15 = arith.addf %9, %14 : vector<16x128xf32>
    %16 = vector.extract_strided_slice %4 {offsets = [0, 2], sizes = [16, 1], strides = [1, 1]} : vector<16x4xf32> to vector<16x1xf32>
    %c2 = arith.constant 2 : index
    %c0_6 = arith.constant 0 : index
    %17 = vector.load %arg3[%c2, %c0_6] : memref<4x128xf32, #tpu.memory_space<vmem>>, vector<1x128xf32>
    %18 = vector.broadcast %16 : vector<16x1xf32> to vector<16x128xf32>
    %19 = vector.broadcast %17 : vector<1x128xf32> to vector<16x128xf32>
    %20 = arith.mulf %18, %19 : vector<16x128xf32>
    %21 = arith.addf %15, %20 : vector<16x128xf32>
    %22 = vector.extract_strided_slice %4 {offsets = [0, 3], sizes = [16, 1], strides = [1, 1]} : vector<16x4xf32> to vector<16x1xf32>
    %c3 = arith.constant 3 : index
    %c0_7 = arith.constant 0 : index
    %23 = vector.load %arg3[%c3, %c0_7] : memref<4x128xf32, #tpu.memory_space<vmem>>, vector<1x128xf32>
    %24 = vector.broadcast %22 : vector<16x1xf32> to vector<16x128xf32>
    %25 = vector.broadcast %23 : vector<1x128xf32> to vector<16x128xf32>
    %26 = arith.mulf %24, %25 : vector<16x128xf32>
    %27 = arith.addf %21, %26 : vector<16x128xf32>
    %c0_8 = arith.constant 0 : index
    %c0_9 = arith.constant 0 : index
    %28 = vector.load %arg4[%c0_8, %c0_9] : memref<1x128xf32, #tpu.memory_space<vmem>>, vector<1x128xf32>
    %29 = vector.broadcast %28 : vector<1x128xf32> to vector<16x128xf32>
    %30 = arith.addf %27, %29 : vector<16x128xf32>
    %cst = arith.constant 0.000000e+00 : f32
    %31 = vector.broadcast %cst : f32 to vector<16x128xf32>
    %32 = arith.maximumf %30, %31 : vector<16x128xf32>
    %c0_10 = arith.constant 0 : index
    %c0_11 = arith.constant 0 : index
    %33 = vector.load %arg5[%c0_10, %c0_11] : memref<128x256xf32, #tpu.memory_space<vmem>>, vector<128x256xf32>
    %cst_12 = arith.constant dense<0.000000e+00> : vector<16x256xf32>
    %34 = tpu.matmul %32, %33, %cst_12 {dimension_numbers = #tpu.dot_dimension_numbers<[1], [0], [0], [1], [0, 0, 1, 1], [], []>} : vector<16x128xf32>, vector<128x256xf32>, vector<16x256xf32> -> vector<16x256xf32>
    %c0_13 = arith.constant 0 : index
    %c0_14 = arith.constant 0 : index
    %35 = vector.load %arg6[%c0_13, %c0_14] : memref<1x256xf32, #tpu.memory_space<vmem>>, vector<1x256xf32>
    %36 = vector.broadcast %35 : vector<1x256xf32> to vector<16x256xf32>
    %37 = arith.addf %34, %36 : vector<16x256xf32>
    %cst_15 = arith.constant 0.000000e+00 : f32
    %38 = vector.broadcast %cst_15 : f32 to vector<16x256xf32>
    %39 = arith.maximumf %37, %38 : vector<16x256xf32>
    %c0_16 = arith.constant 0 : index
    %c0_17 = arith.constant 0 : index
    %40 = vector.load %arg7[%c0_16, %c0_17] : memref<256x512xf32, #tpu.memory_space<vmem>>, vector<256x512xf32>
    %cst_18 = arith.constant dense<0.000000e+00> : vector<16x512xf32>
    %41 = tpu.matmul %39, %40, %cst_18 {dimension_numbers = #tpu.dot_dimension_numbers<[1], [0], [0], [1], [0, 0, 1, 1], [], []>} : vector<16x256xf32>, vector<256x512xf32>, vector<16x512xf32> -> vector<16x512xf32>
    %c0_19 = arith.constant 0 : index
    %c0_20 = arith.constant 0 : index
    %42 = vector.load %arg8[%c0_19, %c0_20] : memref<1x512xf32, #tpu.memory_space<vmem>>, vector<1x512xf32>
    %43 = vector.broadcast %42 : vector<1x512xf32> to vector<16x512xf32>
    %44 = arith.addf %41, %43 : vector<16x512xf32>
    %cst_21 = arith.constant 0.000000e+00 : f32
    %45 = vector.broadcast %cst_21 : f32 to vector<16x512xf32>
    %46 = arith.maximumf %44, %45 : vector<16x512xf32>
    %47 = vector.shape_cast %46 : vector<16x512xf32> to vector<2x8x512xf32>
    %c0_22 = arith.constant 0 : index
    %c0_23 = arith.constant 0 : index
    %48 = vector.load %arg10[%c0_22, %c0_23] : memref<2x512xf32, #tpu.memory_space<vmem>>, vector<2x512xf32>
    %cst_24 = arith.constant dense<0.000000e+00> : vector<2x512xf32>
    %49 = vector.multi_reduction <add>, %47, %cst_24 [1] : vector<2x8x512xf32> to vector<2x512xf32>
    %50 = arith.addf %48, %49 : vector<2x512xf32>
    %c0_25 = arith.constant 0 : index
    %c0_26 = arith.constant 0 : index
    %51 = vector.load %arg10[%c0_25, %c0_26] : memref<2x512xf32, #tpu.memory_space<vmem>>, vector<2x512xf32>
    tpu.vector_store %arg10[%c0_25, %c0_26], %50 {strides = array<i32>} : memref<2x512xf32, #tpu.memory_space<vmem>>, vector<2x512xf32>,
    %c0_i32_27 = arith.constant 0 : i32
    %52 = arith.cmpi eq, %arg1, %c0_i32_27 : i32
    %53 = arith.extui %52 : i1 to i32
    %c0_i32_28 = arith.constant 0 : i32
    %54 = arith.cmpi ne, %53, %c0_i32_28 : i32
    scf.if %54 {
      %c0_29 = arith.constant 0 : index
      %c0_30 = arith.constant 0 : index
      %55 = vector.load %arg10[%c0_29, %c0_30] : memref<2x512xf32, #tpu.memory_space<vmem>>, vector<2x512xf32>
      %cst_31 = arith.constant 1.250000e-01 : f32
      %56 = vector.broadcast %cst_31 : f32 to vector<2x512xf32>
      %57 = arith.mulf %55, %56 : vector<2x512xf32>
      %58 = vector.shape_cast %57 : vector<2x512xf32> to vector<2x1x512xf32>
      %c0_32 = arith.constant 0 : index
      %c0_33 = arith.constant 0 : index
      %c0_34 = arith.constant 0 : index
      %59 = vector.load %arg9[%c0_32, %c0_33, %c0_34] : memref<2x1x512xf32, #tpu.memory_space<vmem>>, vector<2x1x512xf32>
      tpu.vector_store %arg9[%c0_32, %c0_33, %c0_34], %58 {strides = array<i32>} : memref<2x1x512xf32, #tpu.memory_space<vmem>>, vector<2x1x512xf32>,
    } else {
    }
    return
  }
  func.func @transform_0(%arg0: i32, %arg1: i32) -> (i32, i32, i32) {
    %c0_i32 = arith.constant 0 : i32
    %c0_i32_0 = arith.constant 0 : i32
    return %arg0, %arg1, %c0_i32 : i32, i32, i32
  }
  func.func @transform_1(%arg0: i32, %arg1: i32) -> (i32, i32) {
    %c0_i32 = arith.constant 0 : i32
    %c0_i32_0 = arith.constant 0 : i32
    %c0_i32_1 = arith.constant 0 : i32
    return %c0_i32, %c0_i32_0 : i32, i32
  }
  func.func @transform_2(%arg0: i32, %arg1: i32) -> (i32, i32) {
    %c0_i32 = arith.constant 0 : i32
    %c0_i32_0 = arith.constant 0 : i32
    %c0_i32_1 = arith.constant 0 : i32
    return %c0_i32, %c0_i32_0 : i32, i32
  }
  func.func @transform_3(%arg0: i32, %arg1: i32) -> (i32, i32) {
    %c0_i32 = arith.constant 0 : i32
    %c0_i32_0 = arith.constant 0 : i32
    %c0_i32_1 = arith.constant 0 : i32
    return %c0_i32, %c0_i32_0 : i32, i32
  }
  func.func @transform_4(%arg0: i32, %arg1: i32) -> (i32, i32) {
    %c0_i32 = arith.constant 0 : i32
    %c0_i32_0 = arith.constant 0 : i32
    %c0_i32_1 = arith.constant 0 : i32
    return %c0_i32, %c0_i32_0 : i32, i32
  }
  func.func @transform_5(%arg0: i32, %arg1: i32) -> (i32, i32) {
    %c0_i32 = arith.constant 0 : i32
    %c0_i32_0 = arith.constant 0 : i32
    %c0_i32_1 = arith.constant 0 : i32
    return %c0_i32, %c0_i32_0 : i32, i32
  }
  func.func @transform_6(%arg0: i32, %arg1: i32) -> (i32, i32) {
    %c0_i32 = arith.constant 0 : i32
    %c0_i32_0 = arith.constant 0 : i32
    %c0_i32_1 = arith.constant 0 : i32
    return %c0_i32, %c0_i32_0 : i32, i32
  }
  func.func @transform_7(%arg0: i32, %arg1: i32) -> (i32, i32, i32) {
    %c0_i32 = arith.constant 0 : i32
    %c0_i32_0 = arith.constant 0 : i32
    %c0_i32_1 = arith.constant 0 : i32
    return %arg0, %c0_i32, %c0_i32_0 : i32, i32, i32
  }
}

</mosaic_0001>

<bundles_post_ra>
// kernel: tpu_custom_call.1
= control target key start
LH: loop header
LB: loop body
LE: loop exit
PB: predicated region body
PF: predicated region fallthrough
CT: control target
= control target key end

     0   :  { %12 = vsyncpa [#allocation4], 0  ;;  %s924_s0 = inlined_call_operand.vmem [shape: f32[2,8,4], index: 0, kind: input, shape index: {}]   ;;  %s925_s1 = inlined_call_operand.vmem [shape: f32[4,128], index: 1, kind: input, shape index: {}]   ;;  %s926_s2 = inlined_call_operand.vmem [shape: f32[1,128], index: 2, kind: input, shape index: {}]   ;;  %s927_s3 = inlined_call_operand.hbm [shape: f32[128,256], index: 3, kind: input, shape index: {}]   ;;  %s928_s4 = inlined_call_operand.vmem [shape: f32[1,256], index: 4, kind: input, shape index: {}]   ;;  %s929_s5 = inlined_call_operand.hbm [shape: f32[256,512], index: 5, kind: input, shape index: {}]   ;;  %s930_s6 = inlined_call_operand.vmem [shape: f32[1,512], index: 6, kind: input, shape index: {}]   ;;  %s931_s7 = inlined_call_operand.hbm [shape: f32[2,1,512], index: 7, kind: output, shape index: {}]  }
   0x1   :  { %13 = vsyncpa [#allocation7], 0 }
   0x2   :  { %14 = vsyncpa [#allocation5], 0  ;;  %s820_s24 = smov [#allocation3]  }
   0x3   :  { %s26_s25 = sshll.u32 %s820_s24, 4  ;;  %s27_s25 = int_to_ptr.vmem [resolvable:$true] %s26_s25 }
   0x4   :  { %s762_s26 = scalar_lea.vmem %s27_s25, 4096  ;;  %p767_p1 = scmp.lt.s32.totalorder %s27_s25, %s27_s25 }
   0x5   :  { %p763_p0 = scmp.ne.s32.totalorder %s27_s25, %s762_s26  ;;  %p768_p2 = scmp.lt.s32.totalorder %s762_s26, %s762_s26 }
   0x7   :  { %p769_p3 = por %p768_p2, %p767_p1 }
   0x9   :  { %p770_p4 = pnand %p769_p3, %p763_p0 }
   0xb   :  { %773 = shalt.err (!%p770_p4)
}
   0xc   :  { %s821_s27 = smov 256   ;;  %s822_s28 = smov 16  }
   0xd   :  { %32 = dma.hbm_to_vmem [thread:$0]  %s927_s3, 4096, %s27_s25, [#allocation4], %s821_s27, %s821_s27, %s822_s28  }
   0xe   :  { %s823_s8 = smov [#allocation6]  }
   0xf   :  { %s40_s9 = sshll.u32 %s823_s8, 4  ;;  %s41_s9 = int_to_ptr.vmem [resolvable:$true] %s40_s9 }
  0x10   :  { %s782_s10 = scalar_lea.vmem %s41_s9, 16384  ;;  %p787_p6 = scmp.lt.s32.totalorder %s41_s9, %s41_s9 }
  0x11   :  { %p783_p5 = scmp.ne.s32.totalorder %s41_s9, %s782_s10  ;;  %p788_p7 = scmp.lt.s32.totalorder %s782_s10, %s782_s10 }
  0x13   :  { %p789_p8 = por %p788_p7, %p787_p6 }
  0x15   :  { %p790_p9 = pnand %p789_p8, %p783_p5 }
  0x17   :  { %793 = shalt.err (!%p790_p9)
}
  0x18   :  { %s824_s11 = smov 512   ;;  %s825_s12 = smov 32  }
  0x19   :  { %46 = dma.hbm_to_vmem [thread:$0]  %s929_s5, 16384, %s41_s9, [#allocation7], %s824_s11, %s824_s11, %s825_s12  }
  0x1a   :  { %814 = dma.done.wait [#allocation4], 4096  }
  0x1b   :  { %815 = vsyncadd [#allocation4], 4294963200 }
  0x1c   :  { %816 = dma.done.wait [#allocation7], 16384  }
  0x1d   :  { %817 = vsyncadd [#allocation7], 4294950912  ;;  %v826_v0 = vmov 2   ;;  %v827_v1 = vmov 0   ;;  %v60_v2 = vld [vmem:[%s924_s0] sm:$0xff]  ;;  %v172_v3 = vld [vmem:[#allocation3 + $0xf8] sm:$0xff] }
  0x1e   :  { %748 = vset.pattern.permute.xlu1 %v826_v0  ;;  %746 = vset.pattern.permute.xlu0 %v827_v1  ;;  %v171_v4 = vld [vmem:[#allocation3 + $0xf0] sm:$0xff]  ;;  %v170_v5 = vld [vmem:[#allocation3 + $0xe8] sm:$0xff]  ;;  %v169_v7 = vld [vmem:[#allocation3 + $0xe0] sm:$0xff]  ;;  %v828_v8 = vmov 1   ;;  %v829_v12 = vmov 3   ;;  %v830_v18 = vmov 0.0  }
  0x1f   :  { %98 = vperm.xlu1 %748, %v60_v2   ;;  %65 = vperm.xlu0 %746, %v60_v2   ;;  %v61_v6 = vld [vmem:[%s924_s0 + $0x8] sm:$0xff]  ;;  %v168_v9 = vld [vmem:[#allocation3 + $0xd8] sm:$0xff]  ;;  %v167_v10 = vld [vmem:[#allocation3 + $0xd0] sm:$0xff]  ;;  %vm674_vm0 = vcmask 1041409   ;;  %vm676_vm1 = vcmask 1043459   ;;  %vm678_vm2 = vcmask 1045509  }
  0x20   :  { %185 = vmatprep.subr.mxu0 %v172_v3  ;;  %v166_v11 = vld [vmem:[#allocation3 + $0xc8] sm:$0xff]  ;;  %v165_v13 = vld [vmem:[#allocation3 + $0xc0] sm:$0xff]  ;;  %v164_v14 = vld [vmem:[#allocation3 + $0xb8] sm:$0xff]  ;;  %249 = vmatprep.mubr.f32.mxu0 %v830_v18  ;;  %vm680_vm3 = vcmask 1047559  }
  0x21   :  { %186 = vmatpush1.msra.mxu0 %v171_v4  ;;  %v163_v15 = vld [vmem:[#allocation3 + $0xb0] sm:$0xff]  ;;  %v162_v16 = vld [vmem:[#allocation3 + $0xa8] sm:$0xff]  ;;  %v161_v17 = vld [vmem:[#allocation3 + $0xa0] sm:$0xff] }
  0x22   :  { %187 = vmatprep.subr.mxu0 %v170_v5  ;;  %v160_v19 = vld [vmem:[#allocation3 + $0x98] sm:$0xff]  ;;  %v159_v20 = vld [vmem:[#allocation3 + $0x90] sm:$0xff]  ;;  %v158_v21 = vld [vmem:[#allocation3 + $0x88] sm:$0xff] }
  0x23   :  { %749 = vset.pattern.permute.xlu1 %v827_v1  ;;  %747 = vset.pattern.permute.xlu0 %v828_v8  ;;  %v157_v22 = vld [vmem:[#allocation3 + $0x80] sm:$0xff]  ;;  %v156_v23 = vld [vmem:[#allocation3 + $0x78] sm:$0xff]  ;;  %v155_v24 = vld [vmem:[#allocation3 + $0x70] sm:$0xff] }
  0x24   :  { %70 = vperm.xlu1 %749, %v61_v6   ;;  %81 = vperm.xlu0 %747, %v60_v2   ;;  %v154_v25 = vld [vmem:[#allocation3 + $0x68] sm:$0xff]  ;;  %v153_v26 = vld [vmem:[#allocation3 + $0x60] sm:$0xff]  ;;  %v152_v27 = vld [vmem:[#allocation3 + $0x58] sm:$0xff] }
  0x25   :  { %188 = vmatpush1.msra.mxu0 %v169_v7  ;;  %v151_v28 = vld [vmem:[#allocation3 + $0x50] sm:$0xff]  ;;  %v150_v29 = vld [vmem:[#allocation3 + $0x48] sm:$0xff]  ;;  %v326_v31 = vld [vmem:[#allocation6 + $0x1e0] sm:$0xff] }
  0x26   :  { %189 = vmatprep.subr.mxu0 %v168_v9  ;;  %v327_v30 = vld [vmem:[#allocation6 + $0x1e8] sm:$0xff]  ;;  %v149_v32 = vld [vmem:[#allocation3 + $0x40] sm:$0xff]  ;;  %v148_v34 = vld [vmem:[#allocation3 + $0x38] sm:$0xff] }
  0x27   :  { %190 = vmatpush1.msra.mxu0 %v167_v10  ;;  %416 = vmatprep.subr.mxu1 %v327_v30  ;;  %v323_v33 = vld [vmem:[#allocation6 + $0x1c8] sm:$0xff]  ;;  %v322_v35 = vld [vmem:[#allocation6 + $0x1c0] sm:$0xff]  ;;  %v147_v37 = vld [vmem:[#allocation3 + $0x30] sm:$0xff] }
  0x28   :  { %750 = vset.pattern.permute.xlu1 %v828_v8  ;;  %751 = vset.pattern.permute.xlu0 %v829_v12  ;;  %v319_v36 = vld [vmem:[#allocation6 + $0x1a8] sm:$0xff]  ;;  %v318_v38 = vld [vmem:[#allocation6 + $0x1a0] sm:$0xff]  ;;  %v144_v43 = vld [vmem:[#allocation3 + $0x18] sm:$0xff] }
  0x29   :  { %85 = vperm.xlu1 %750, %v61_v6   ;;  %115 = vperm.xlu0 %751, %v60_v2   ;;  %v146_v39 = vld [vmem:[#allocation3 + $0x28] sm:$0xff]  ;;  %v145_v41 = vld [vmem:[#allocation3 + $0x20] sm:$0xff]  ;;  %v143_v45 = vld [vmem:[#allocation3 + $0x10] sm:$0xff] }
  0x2a   :  { %191 = vmatprep.subr.mxu0 %v166_v11  ;;  %417 = vmatpush1.msra.mxu1 %v326_v31  ;;  %v315_v40 = vld [vmem:[#allocation6 + $0x188] sm:$0xff]  ;;  %v314_v42 = vld [vmem:[#allocation6 + $0x180] sm:$0xff]  ;;  %v329_v51 = vld [vmem:[#allocation6 + $0x1f8] sm:$0xff] }
  0x2b   :  { %192 = vmatpush1.msra.mxu0 %v165_v13  ;;  %418 = vmatprep.subr.mxu1 %v323_v33  ;;  %v311_v44 = vld [vmem:[#allocation6 + $0x168] sm:$0xff]  ;;  %v310_v46 = vld [vmem:[#allocation6 + $0x160] sm:$0xff] }
  0x2c   :  { %193 = vmatprep.subr.mxu0 %v164_v14  ;;  %419 = vmatpush1.msra.mxu1 %v322_v35  ;;  %v142_v47 = vld [vmem:[#allocation3 + $0x8] sm:$0xff]  ;;  %v141_v49 = vld [vmem:[#allocation3] sm:$0xff] }
  0x2d   :  { %752 = vset.pattern.permute.xlu1 %v826_v0  ;;  %194 = vmatpush1.msra.mxu0 %v163_v15  ;;  %v307_v48 = vld [vmem:[#allocation6 + $0x148] sm:$0xff]  ;;  %v306_v50 = vld [vmem:[#allocation6 + $0x140] sm:$0xff] }
  0x2e   :  { %102 = vperm.xlu1 %752, %v61_v6   ;;  %195 = vmatprep.subr.mxu0 %v162_v16  ;;  %v303_v52 = vld [vmem:[#allocation6 + $0x128] sm:$0xff]  ;;  %v302_v53 = vld [vmem:[#allocation6 + $0x120] sm:$0xff] }
  0x2f   :  { %196 = vmatpush1.msra.mxu0 %v161_v17  ;;  %420 = vmatprep.subr.mxu1 %v319_v36  ;;  %v299_v54 = vld [vmem:[#allocation6 + $0x108] sm:$0xff]  ;;  %v298_v55 = vld [vmem:[#allocation6 + $0x100] sm:$0xff] }
  0x30   :  { %197 = vmatprep.subr.mxu0 %v160_v19  ;;  %421 = vmatpush1.msra.mxu1 %v318_v38  ;;  %v295_v56 = vld [vmem:[#allocation6 + $0xe8] sm:$0xff]  ;;  %v294_v57 = vld [vmem:[#allocation6 + $0xe0] sm:$0xff] }
  0x31   :  { %198 = vmatpush1.msra.mxu0 %v159_v20  ;;  %422 = vmatprep.subr.mxu1 %v315_v40  ;;  %v291_v58 = vld [vmem:[#allocation6 + $0xc8] sm:$0xff]  ;;  %v290_v59 = vld [vmem:[#allocation6 + $0xc0] sm:$0xff] }
  0x32   :  { %753 = vset.pattern.permute.xlu1 %v829_v12  ;;  %199 = vmatprep.subr.mxu0 %v158_v21  ;;  %v287_v60 = vld [vmem:[#allocation6 + $0xa8] sm:$0xff]  ;;  %v286_v61 = vld [vmem:[#allocation6 + $0xa0] sm:$0xff] }
  0x33   :  { %119 = vperm.xlu1 %753, %v61_v6   ;;  %200 = vmatpush1.msra.mxu0 %v157_v22  ;;  %v283_v62 = vld [vmem:[#allocation6 + $0x88] sm:$0xff]  ;;  %v282_v63 = vld [vmem:[#allocation6 + $0x80] sm:$0xff] }
  0x34   :  { %201 = vmatprep.subr.mxu0 %v156_v23  ;;  %423 = vmatpush1.msra.mxu1 %v314_v42  ;;  %v279_v0 = vld [vmem:[#allocation6 + $0x68] sm:$0xff]  ;;  %v278_v1 = vld [vmem:[#allocation6 + $0x60] sm:$0xff] }
  0x35   :  { %202 = vmatpush1.msra.mxu0 %v155_v24  ;;  %424 = vmatprep.subr.mxu1 %v311_v44  ;;  %v275_v2 = vld [vmem:[#allocation6 + $0x48] sm:$0xff]  ;;  %v274_v3 = vld [vmem:[#allocation6 + $0x40] sm:$0xff] }
  0x36   :  { %203 = vmatprep.subr.mxu0 %v154_v25  ;;  %425 = vmatpush1.msra.mxu1 %v310_v46  ;;  %v271_v4 = vld [vmem:[#allocation6 + $0x28] sm:$0xff]  ;;  %v270_v5 = vld [vmem:[#allocation6 + $0x20] sm:$0xff] }
  0x37   :  { %204 = vmatpush1.msra.mxu0 %v153_v26  ;;  %426 = vmatprep.subr.mxu1 %v307_v48  ;;  %v267_v6 = vld [vmem:[#allocation6 + $0x8] sm:$0xff]  ;;  %v266_v7 = vld [vmem:[#allocation6] sm:$0xff] }
  0x38   :  { %205 = vmatprep.subr.mxu0 %v152_v27  ;;  %427 = vmatpush1.msra.mxu1 %v306_v50  ;;  %v391_v8 = vld [vmem:[#allocation6 + $0x3e8] sm:$0xff]  ;;  %v390_v9 = vld [vmem:[#allocation6 + $0x3e0] sm:$0xff] }
  0x39   :  { %206 = vmatpush1.msra.mxu0 %v151_v28  ;;  %428 = vmatprep.subr.mxu1 %v303_v52  ;;  %v387_v10 = vld [vmem:[#allocation6 + $0x3c8] sm:$0xff]  ;;  %v386_v11 = vld [vmem:[#allocation6 + $0x3c0] sm:$0xff] }
  0x3a   :  { %207 = vmatprep.subr.mxu0 %v150_v29  ;;  %429 = vmatpush1.msra.mxu1 %v302_v53  ;;  %v383_v12 = vld [vmem:[#allocation6 + $0x3a8] sm:$0xff]  ;;  %v382_v13 = vld [vmem:[#allocation6 + $0x3a0] sm:$0xff] }
  0x3b   :  { %208 = vmatpush1.msra.mxu0 %v149_v32  ;;  %430 = vmatprep.subr.mxu1 %v299_v54  ;;  %v379_v14 = vld [vmem:[#allocation6 + $0x388] sm:$0xff]  ;;  %v378_v15 = vld [vmem:[#allocation6 + $0x380] sm:$0xff] }
  0x3c   :  { %209 = vmatprep.subr.mxu0 %v148_v34  ;;  %431 = vmatpush1.msra.mxu1 %v298_v55  ;;  %v375_v16 = vld [vmem:[#allocation6 + $0x368] sm:$0xff]  ;;  %v374_v17 = vld [vmem:[#allocation6 + $0x360] sm:$0xff] }
  0x3d   :  { %210 = vmatpush1.msra.mxu0 %v147_v37  ;;  %432 = vmatprep.subr.mxu1 %v295_v56  ;;  %v371_v19 = vld [vmem:[#allocation6 + $0x348] sm:$0xff]  ;;  %v370_v20 = vld [vmem:[#allocation6 + $0x340] sm:$0xff] }
  0x3e   :  { %211 = vmatprep.subr.mxu0 %v146_v39  ;;  %433 = vmatpush1.msra.mxu1 %v294_v57  ;;  %v367_v21 = vld [vmem:[#allocation6 + $0x328] sm:$0xff]  ;;  %v366_v22 = vld [vmem:[#allocation6 + $0x320] sm:$0xff]  ;;  %v328_v57 = vld [vmem:[#allocation6 + $0x1f0] sm:$0xff] }
  0x3f   :  { %212 = vmatpush1.msra.mxu0 %v145_v41  ;;  %434 = vmatprep.subr.mxu1 %v291_v58  ;;  %v363_v23 = vld [vmem:[#allocation6 + $0x308] sm:$0xff]  ;;  %v362_v24 = vld [vmem:[#allocation6 + $0x300] sm:$0xff]  ;;  %v325_v58 = vld [vmem:[#allocation6 + $0x1d8] sm:$0xff] }
  0x40   :  { %213 = vmatprep.subr.mxu0 %v144_v43  ;;  %435 = vmatpush1.msra.mxu1 %v290_v59  ;;  %v359_v25 = vld [vmem:[#allocation6 + $0x2e8] sm:$0xff]  ;;  %v358_v26 = vld [vmem:[#allocation6 + $0x2e0] sm:$0xff] }
  0x41   :  { %214 = vmatpush1.msra.mxu0 %v143_v45  ;;  %436 = vmatprep.subr.mxu1 %v287_v60  ;;  %v355_v27 = vld [vmem:[#allocation6 + $0x2c8] sm:$0xff]  ;;  %v354_v28 = vld [vmem:[#allocation6 + $0x2c0] sm:$0xff]  ;;  %v324_v60 = vld [vmem:[#allocation6 + $0x1d0] sm:$0xff] }
  0x42   :  { %215 = vmatprep.subr.mxu0 %v142_v47  ;;  %437 = vmatpush1.msra.mxu1 %v286_v61  ;;  %v351_v29 = vld [vmem:[#allocation6 + $0x2a8] sm:$0xff]  ;;  %v350_v30 = vld [vmem:[#allocation6 + $0x2a0] sm:$0xff] }
  0x43   :  { %216 = vmatpush1.msra.mxu0 %v141_v49  ;;  %438 = vmatprep.subr.mxu1 %v283_v62  ;;  %v347_v31 = vld [vmem:[#allocation6 + $0x288] sm:$0xff]  ;;  %v346_v32 = vld [vmem:[#allocation6 + $0x280] sm:$0xff]  ;;  %v321_v62 = vld [vmem:[#allocation6 + $0x1b8] sm:$0xff] }
  0x44   :  { %493 = vmatprep.subr.mxu0 %v329_v51  ;;  %439 = vmatpush1.msra.mxu1 %v282_v63  ;;  %v725_v35 = vld [vmem:[%s925_s1] ss:$0 sm:$0xff]  ;;  %v726_v36 = vld [vmem:[%s925_s1 + $0x1] ss:$0 sm:$0xff]  ;;  %v727_v38 = vld [vmem:[%s925_s1 + $0x2] ss:$0 sm:$0xff] }
  0x45   :  { %440 = vmatprep.subr.mxu1 %v279_v0  ;;  %v728_v44 = vld [vmem:[%s925_s1 + $0x3] ss:$0 sm:$0xff]  ;;  %v729_v49 = vld [vmem:[%s926_s2] ss:$0 sm:$0xff] }
  0x46   :  { %441 = vmatpush1.msra.mxu1 %v278_v1  ;;  %v320_v1 = vld [vmem:[#allocation6 + $0x1b0] sm:$0xff] }
  0x47   :  { %442 = vmatprep.subr.mxu1 %v275_v2  ;;  %v317_v2 = vld [vmem:[#allocation6 + $0x198] sm:$0xff] }
  0x48   :  { %443 = vmatpush1.msra.mxu1 %v274_v3 }
  0x49   :  { %444 = vmatprep.subr.mxu1 %v271_v4  ;;  %v316_v4 = vld [vmem:[#allocation6 + $0x190] sm:$0xff] }
  0x4a   :  { %445 = vmatpush1.msra.mxu1 %v270_v5  ;;  %v313_v5 = vld [vmem:[#allocation6 + $0x178] sm:$0xff] }
  0x4b   :  { %446 = vmatprep.subr.mxu1 %v267_v6 }
  0x4c   :  { %447 = vmatpush1.msra.mxu1 %v266_v7  ;;  %v312_v7 = vld [vmem:[#allocation6 + $0x170] sm:$0xff] }
  0x4d   :  { %448 = vmatprep.subr.mxu1 %v391_v8  ;;  %v309_v8 = vld [vmem:[#allocation6 + $0x158] sm:$0xff] }
  0x4e   :  { %449 = vmatpush2.msra.mxu1 %v390_v9 }
  0x4f   :  { %450 = vmatprep.subr.mxu1 %v387_v10  ;;  %v305_v10 = vld [vmem:[#allocation6 + $0x138] sm:$0xff] }
  0x50   :  { %451 = vmatpush2.msra.mxu1 %v386_v11  ;;  %v304_v11 = vld [vmem:[#allocation6 + $0x130] sm:$0xff] }
  0x51   :  { %452 = vmatprep.subr.mxu1 %v383_v12  ;;  %v301_v12 = vld [vmem:[#allocation6 + $0x118] sm:$0xff] }
  0x52   :  { %453 = vmatpush2.msra.mxu1 %v382_v13  ;;  %v300_v13 = vld [vmem:[#allocation6 + $0x110] sm:$0xff] }
  0x53   :  { %454 = vmatprep.subr.mxu1 %v379_v14  ;;  %v297_v14 = vld [vmem:[#allocation6 + $0xf8] sm:$0xff] }
  0x54   :  { %455 = vmatpush2.msra.mxu1 %v378_v15  ;;  %v296_v15 = vld [vmem:[#allocation6 + $0xf0] sm:$0xff] }
  0x55   :  { %456 = vmatprep.subr.mxu1 %v375_v16  ;;  %v293_v16 = vld [vmem:[#allocation6 + $0xd8] sm:$0xff] }
  0x56   :  { %457 = vmatpush2.msra.mxu1 %v374_v17  ;;  %v292_v17 = vld [vmem:[#allocation6 + $0xd0] sm:$0xff] }
  0x57   :  { %458 = vmatprep.subr.mxu1 %v371_v19  ;;  %v289_v19 = vld [vmem:[#allocation6 + $0xb8] sm:$0xff] }
  0x58   :  { %459 = vmatpush2.msra.mxu1 %v370_v20  ;;  %v288_v20 = vld [vmem:[#allocation6 + $0xb0] sm:$0xff] }
  0x59   :  { %460 = vmatprep.subr.mxu1 %v367_v21  ;;  %v285_v21 = vld [vmem:[#allocation6 + $0x98] sm:$0xff] }
  0x5a   :  { %461 = vmatpush2.msra.mxu1 %v366_v22  ;;  %v284_v22 = vld [vmem:[#allocation6 + $0x90] sm:$0xff] }
  0x5b   :  { %462 = vmatprep.subr.mxu1 %v363_v23  ;;  %v281_v23 = vld [vmem:[#allocation6 + $0x78] sm:$0xff] }
  0x5c   :  { %463 = vmatpush2.msra.mxu1 %v362_v24  ;;  %v280_v24 = vld [vmem:[#allocation6 + $0x70] sm:$0xff] }
  0x5d   :  { %464 = vmatprep.subr.mxu1 %v359_v25  ;;  %v277_v25 = vld [vmem:[#allocation6 + $0x58] sm:$0xff] }
  0x5e   :  { %465 = vmatpush2.msra.mxu1 %v358_v26  ;;  %v276_v26 = vld [vmem:[#allocation6 + $0x50] sm:$0xff] }
  0x5f   :  { %466 = vmatprep.subr.mxu1 %v355_v27  ;;  %v273_v27 = vld [vmem:[#allocation6 + $0x38] sm:$0xff] }
  0x60   :  { %467 = vmatpush2.msra.mxu1 %v354_v28  ;;  %v272_v28 = vld [vmem:[#allocation6 + $0x30] sm:$0xff] }
  0x61   :  { %468 = vmatprep.subr.mxu1 %v351_v29  ;;  %v269_v29 = vld [vmem:[#allocation6 + $0x18] sm:$0xff] }
  0x62   :  { %469 = vmatpush2.msra.mxu1 %v350_v30  ;;  %v268_v30 = vld [vmem:[#allocation6 + $0x10] sm:$0xff] }
  0x63   :  { %470 = vmatprep.subr.mxu1 %v347_v31  ;;  %v393_v31 = vld [vmem:[#allocation6 + $0x3f8] sm:$0xff] }
  0x64   :  { %471 = vmatpush2.msra.mxu1 %v346_v32  ;;  %v392_v32 = vld [vmem:[#allocation6 + $0x3f0] sm:$0xff] }
  0x9a   :  { %v99_v33 = vpop.permute.xlu1 %98  ;;  %v66_v34 = vpop.permute.xlu0 %65 }
  0x9b   :  { %v77_v37 = vmul.f32 %v725_v35, %v66_v34  ;;  %v109_v42 = vmul.f32 %v727_v38, %v99_v33  ;;  %v389_v33 = vld [vmem:[#allocation6 + $0x3d8] sm:$0xff]  ;;  %v388_v34 = vld [vmem:[#allocation6 + $0x3d0] sm:$0xff] }
  0x9f   :  { %v71_v39 = vpop.permute.xlu1 %70  ;;  %v82_v40 = vpop.permute.xlu0 %81 }
  0xa0   :  { %v92_v41 = vmul.f32 %v726_v36, %v82_v40  ;;  %v78_v54 = vmul.f32 %v725_v35, %v71_v39  ;;  %v385_v35 = vld [vmem:[#allocation6 + $0x3b8] sm:$0xff]  ;;  %v376_v40 = vld [vmem:[#allocation6 + $0x370] sm:$0xff] }
  0xa1   :  { %v377_v39 = vld [vmem:[#allocation6 + $0x378] sm:$0xff] }
  0xa2   :  { %v94_v43 = vadd.f32 %v92_v41, %v77_v37  ;;  %v381_v37 = vld [vmem:[#allocation6 + $0x398] sm:$0xff] }
  0xa3   :  { %v373_v41 = vld [vmem:[#allocation6 + $0x358] sm:$0xff] }
  0xa4   :  { %v86_v45 = vpop.permute.xlu1 %85  ;;  %v111_v46 = vadd.f32 %v109_v42, %v94_v43  ;;  %v116_v47 = vpop.permute.xlu0 %115  ;;  %v372_v42 = vld [vmem:[#allocation6 + $0x350] sm:$0xff]  ;;  %v369_v43 = vld [vmem:[#allocation6 + $0x338] sm:$0xff] }
  0xa5   :  { %v126_v48 = vmul.f32 %v728_v44, %v116_v47  ;;  %v93_v51 = vmul.f32 %v726_v36, %v86_v45  ;;  %v384_v36 = vld [vmem:[#allocation6 + $0x3b0] sm:$0xff]  ;;  %v365_v45 = vld [vmem:[#allocation6 + $0x318] sm:$0xff] }
  0xa6   :  { %v361_v47 = vld [vmem:[#allocation6 + $0x2f8] sm:$0xff] }
  0xa7   :  { %v128_v50 = vadd.f32 %v126_v48, %v111_v46  ;;  %v95_v59 = vadd.f32 %v93_v51, %v78_v54  ;;  %v364_v46 = vld [vmem:[#allocation6 + $0x310] sm:$0xff]  ;;  %v353_v51 = vld [vmem:[#allocation6 + $0x2b8] sm:$0xff] }
  0xa8   :  { %v360_v48 = vld [vmem:[#allocation6 + $0x2f0] sm:$0xff] }
  0xa9   :  { %v103_v52 = vpop.permute.xlu1 %102  ;;  %v137_v53 = vadd.f32 %v729_v49, %v128_v50  ;;  %v356_v50 = vld [vmem:[#allocation6 + $0x2d0] sm:$0xff] }
  0xaa   :  { %v110_v55 = vmul.f32 %v727_v38, %v103_v52  ;;  %v380_v38 = vld [vmem:[#allocation6 + $0x390] sm:$0xff] }
  0xab   :  { %v139_v56 = vmax.f32 %v137_v53, 0.0  ;;  %v352_v52 = vld [vmem:[#allocation6 + $0x2b0] sm:$0xff]  ;;  %v349_v53 = vld [vmem:[#allocation6 + $0x298] sm:$0xff] }
  0xac   :  { %v112_v63 = vadd.f32 %v110_v55, %v95_v59  ;;  %v348_v54 = vld [vmem:[#allocation6 + $0x290] sm:$0xff]  ;;  %v343_v55 = vld [vmem:[#allocation6 + $0x268] sm:$0xff] }
  0xad   :  { %250 = vmatmul.mubr.f32.vlgmr.msra.gmra.mxu0 %v139_v56  ;;  %v345_v56 = vld [vmem:[#allocation6 + $0x278] sm:$0xff]  ;;  %472 = vmatprep.subr.mxu1 %v343_v55  ;;  %v339_v59 = vld [vmem:[#allocation6 + $0x248] sm:$0xff] }
  0xae   :  { %v120_v61 = vpop.permute.xlu1 %119  ;;  %255 = vmatprep.mubr.f32.mxu0 %v830_v18  ;;  %494 = vmatpush1.msra.mxu0 %v328_v57  ;;  %v308_v18 = vld [vmem:[#allocation6 + $0x150] sm:$0xff]  ;;  %v342_v57 = vld [vmem:[#allocation6 + $0x260] sm:$0xff] }
  0xaf   :  { %v127_v0 = vmul.f32 %v728_v44, %v120_v61  ;;  %495 = vmatprep.subr.mxu0 %v325_v58  ;;  %v368_v44 = vld [vmem:[#allocation6 + $0x330] sm:$0xff]  ;;  %473 = vmatpush2.msra.mxu1 %v342_v57  ;;  %v338_v61 = vld [vmem:[#allocation6 + $0x240] sm:$0xff] }
  0xb0   :  { %496 = vmatpush1.msra.mxu0 %v324_v60  ;;  %v344_v58 = vld [vmem:[#allocation6 + $0x270] sm:$0xff]  ;;  %v341_v60 = vld [vmem:[#allocation6 + $0x258] sm:$0xff]  ;;  %474 = vmatprep.subr.mxu1 %v339_v59 }
  0xb1   :  { %v129_v3 = vadd.f32 %v127_v0, %v112_v63  ;;  %497 = vmatprep.subr.mxu0 %v321_v62  ;;  %v340_v62 = vld [vmem:[#allocation6 + $0x250] sm:$0xff]  ;;  %475 = vmatpush2.msra.mxu1 %v338_v61  ;;  %v335_v63 = vld [vmem:[#allocation6 + $0x228] sm:$0xff]  ;;  %v337_v0 = vld [vmem:[#allocation6 + $0x238] sm:$0xff] }
  0xb2   :  { %498 = vmatpush1.msra.mxu0 %v320_v1  ;;  %476 = vmatprep.subr.mxu1 %v335_v63  ;;  %v334_v1 = vld [vmem:[#allocation6 + $0x220] sm:$0xff] }
  0xb3   :  { %v138_v6 = vadd.f32 %v729_v49, %v129_v3  ;;  %499 = vmatprep.subr.mxu0 %v317_v2  ;;  %v357_v49 = vld [vmem:[#allocation6 + $0x2d8] sm:$0xff]  ;;  %v336_v2 = vld [vmem:[#allocation6 + $0x230] sm:$0xff]  ;;  %477 = vmatpush2.msra.mxu1 %v334_v1  ;;  %v331_v3 = vld [vmem:[#allocation6 + $0x208] sm:$0xff] }
  0xb4   :  { %500 = vmatpush1.msra.mxu0 %v316_v4  ;;  %v333_v4 = vld [vmem:[#allocation6 + $0x218] sm:$0xff]  ;;  %478 = vmatprep.subr.mxu1 %v331_v3 }
  0xb5   :  { %v140_v9 = vmax.f32 %v138_v6, 0.0  ;;  %501 = vmatprep.subr.mxu0 %v313_v5  ;;  %v330_v5 = vld [vmem:[#allocation6 + $0x200] sm:$0xff]  ;;  %v332_v6 = vld [vmem:[#allocation6 + $0x210] sm:$0xff] }
  0xb6   :  { %502 = vmatpush1.msra.mxu0 %v312_v7  ;;  %479 = vmatpush2.msra.mxu1 %v330_v5  ;;  %v175_v7 = vlaneseq }
  0xb7   :  { %256 = vmatmul.mubr.f32.gmra.mxu0 %v140_v9  ;;  %503 = vmatprep.subr.mxu0 %v309_v8 }
  0xb8   :  { %504 = vmatpush1.msra.mxu0 %v308_v18  ;;  %v906_v8 = vshrl.u32 %v175_v7, 7  ;;  %v173_v18 = vld [vmem:[%s928_s4] sm:$0x3]  ;;  %vm703_vm4 = vcmp.lt.s32.totalorder %v175_v7, 512 }
  0xb9   :  { %505 = vmatprep.subr.mxu0 %v305_v10 }
  0xba   :  { %506 = vmatpush1.msra.mxu0 %v304_v11  ;;  %v177_v9 = vsub.s32 0, %v906_v8  ;;  %v181_v10 = vsub.s32 1, %v906_v8 }
  0xbb   :  { %507 = vmatprep.subr.mxu0 %v301_v12 }
  0xbc   :  { %508 = vmatpush1.msra.mxu0 %v300_v13  ;;  %v178_v11 = vrot.slane %v173_v18, %v177_v9  ;;  %v182_v12 = vrot.slane %v173_v18, %v181_v10 }
  0xbd   :  { %509 = vmatprep.subr.mxu0 %v297_v14 }
  0xbe   :  { %510 = vmatpush1.msra.mxu0 %v296_v15 }
  0xbf   :  { %511 = vmatprep.subr.mxu0 %v293_v16 }
  0xc0   :  { %512 = vmatpush1.msra.mxu0 %v292_v17 }
  0xc1   :  { %513 = vmatprep.subr.mxu0 %v289_v19 }
  0xc2   :  { %514 = vmatpush1.msra.mxu0 %v288_v20 }
  0xc3   :  { %515 = vmatprep.subr.mxu0 %v285_v21 }
  0xc4   :  { %516 = vmatpush1.msra.mxu0 %v284_v22 }
  0xc5   :  { %517 = vmatprep.subr.mxu0 %v281_v23 }
  0xc6   :  { %518 = vmatpush1.msra.mxu0 %v280_v24 }
  0xc7   :  { %519 = vmatprep.subr.mxu0 %v277_v25 }
  0xc8   :  { %520 = vmatpush1.msra.mxu0 %v276_v26  ;;  %v406_v26 = vsub.s32 2, %v906_v8 }
  0xc9   :  { %521 = vmatprep.subr.mxu0 %v273_v27  ;;  %v394_v27 = vld [vmem:[%s930_s6] sm:$0xf]  ;;  %s833_s6 = smov [#allocation8]  }
  0xca   :  { %522 = vmatpush1.msra.mxu0 %v272_v28  ;;  %v410_v28 = vsub.s32 3, %v906_v8  ;;  %s712_s27 = sshll.u32 %s833_s6, 4  ;;  %s713_s27 = int_to_ptr.vmem [resolvable:$true] %s712_s27 }
  0xcb   :  { %523 = vmatprep.subr.mxu0 %v269_v29  ;;  %v399_v29 = vrot.slane %v394_v27, %v177_v9  ;;  %s794_s28 = scalar_lea.vmem %s713_s27, 128  ;;  %p799_p11 = scmp.lt.s32.totalorder %s713_s27, %s713_s27 }
  0xcc   :  { %524 = vmatpush1.msra.mxu0 %v268_v30  ;;  %v407_v30 = vrot.slane %v394_v27, %v406_v26  ;;  %p795_p10 = scmp.ne.s32.totalorder %s713_s27, %s794_s28  ;;  %p800_p12 = scmp.lt.s32.totalorder %s794_s28, %s794_s28 }
  0xcd   :  { %525 = vmatprep.subr.mxu0 %v393_v31  ;;  %v403_v31 = vrot.slane %v394_v27, %v181_v10 }
  0xce   :  { %526 = vmatpush2.msra.mxu0 %v392_v32  ;;  %v411_v32 = vrot.slane %v394_v27, %v410_v28  ;;  %p801_p13 = por %p800_p12, %p799_p11 }
  0xcf   :  { %527 = vmatprep.subr.mxu0 %v389_v33 }
  0xd0   :  { %528 = vmatpush2.msra.mxu0 %v388_v34  ;;  %p802_p0 = pnand %p801_p13, %p795_p10 }
  0xd1   :  { %529 = vmatprep.subr.mxu0 %v385_v35 }
  0xd2   :  { %530 = vmatpush2.msra.mxu0 %v384_v36 }
  0xd3   :  { %531 = vmatprep.subr.mxu0 %v381_v37 }
  0xd4   :  { %532 = vmatpush2.msra.mxu0 %v380_v38 }
  0xd5   :  { %533 = vmatprep.subr.mxu0 %v377_v39 }
  0xd6   :  { %534 = vmatpush2.msra.mxu0 %v376_v40 }
  0xd7   :  { %535 = vmatprep.subr.mxu0 %v373_v41 }
  0xd8   :  { %536 = vmatpush2.msra.mxu0 %v372_v42 }
  0xd9   :  { %537 = vmatprep.subr.mxu0 %v369_v43 }
  0xda   :  { %538 = vmatpush2.msra.mxu0 %v368_v44 }
  0xdb   :  { %539 = vmatprep.subr.mxu0 %v365_v45 }
  0xdc   :  { %540 = vmatpush2.msra.mxu0 %v364_v46 }
  0xdd   :  { %541 = vmatprep.subr.mxu0 %v361_v47 }
  0xde   :  { %542 = vmatpush2.msra.mxu0 %v360_v48 }
  0xdf   :  { %543 = vmatprep.subr.mxu0 %v357_v49 }
  0xe0   :  { %544 = vmatpush2.msra.mxu0 %v356_v50 }
  0xe1   :  { %545 = vmatprep.subr.mxu0 %v353_v51 }
  0xe2   :  { %546 = vmatpush2.msra.mxu0 %v352_v52 }
  0xe3   :  { %547 = vmatprep.subr.mxu0 %v349_v53 }
  0xe4   :  { %548 = vmatpush2.msra.mxu0 %v348_v54 }
  0xe5   :  { %549 = vmatprep.subr.mxu0 %v345_v56 }
  0xe6   :  { %550 = vmatpush2.msra.mxu0 %v344_v58 }
  0xe7   :  { %551 = vmatprep.subr.mxu0 %v341_v60 }
  0xe8   :  { %552 = vmatpush2.msra.mxu0 %v340_v62 }
  0xe9   :  { %553 = vmatprep.subr.mxu0 %v337_v0 }
  0xea   :  { %554 = vmatpush2.msra.mxu0 %v336_v2 }
  0xeb   :  { %555 = vmatprep.subr.mxu0 %v333_v4 }
  0xec   :  { %556 = vmatpush2.msra.mxu0 %v332_v6 }
 0x16d   :  { %v251_v13 = vpop.f32.mrf.mxu0 }
 0x16e   :  { %v252_v14 = vadd.f32 %v251_v13, %v178_v11 }
 0x16f   :  { %v253_v15 = vpop.f32.mrf.mxu0 }
 0x170   :  { %v254_v16 = vadd.f32 %v253_v15, %v182_v12  ;;  %v262_v19 = vmax.f32 %v252_v14, 0.0 }
 0x172   :  { %v263_v17 = vmax.f32 %v254_v16, 0.0 }
 0x174   :  { %480 = vmatprep.mubr.f32.mxu1 %v263_v17  ;;  %557 = vmatprep.mubr.f32.mxu0 %v263_v17  ;;  %v831_v17 = vmov 1983009808  }
 0x175   :  { %481 = vmatmul.mubr.f32.vlgmr.msra.gmra.mxu1 %v262_v19  ;;  %558 = vmatmul.mubr.f32.vlgmr.msra.gmra.mxu0 %v262_v19  ;;  %v638_v19 = vunpack.c.l.s4 %v831_v17 }
 0x177   :  { %v257_v20 = vpop.f32.mrf.mxu0 }
 0x178   :  { %v258_v21 = vadd.f32 %v257_v20, %v178_v11 }
 0x179   :  { %v259_v22 = vpop.f32.mrf.mxu0 }
 0x17a   :  { %v260_v23 = vadd.f32 %v259_v22, %v182_v12  ;;  %v264_v25 = vmax.f32 %v258_v21, 0.0 }
 0x17c   :  { %v265_v24 = vmax.f32 %v260_v23, 0.0 }
 0x17e   :  { %486 = vmatprep.mubr.f32.mxu1 %v265_v24  ;;  %563 = vmatprep.mubr.f32.mxu0 %v265_v24 }
 0x17f   :  { %487 = vmatmul.mubr.f32.gmra.mxu1 %v264_v25  ;;  %564 = vmatmul.mubr.f32.gmra.mxu0 %v264_v25 }
 0x235   :  { %v482_v33 = vpop.f32.mrf.mxu1  ;;  %v559_v34 = vpop.f32.mrf.mxu0 }
 0x236   :  { %v483_v35 = vadd.f32 %v482_v33, %v399_v29  ;;  %v560_v36 = vadd.f32 %v559_v34, %v407_v30 }
 0x237   :  { %v484_v37 = vpop.f32.mrf.mxu1  ;;  %v561_v38 = vpop.f32.mrf.mxu0 }
 0x238   :  { %v570_v39 = vmax.f32 %v483_v35, 0.0  ;;  %v572_v40 = vmax.f32 %v560_v36, 0.0  ;;  %v485_v41 = vadd.f32 %v484_v37, %v403_v31  ;;  %v562_v42 = vadd.f32 %v561_v38, %v411_v32 }
 0x23a   :  { %v579_v43 = vrot.slane %v570_v39, 4  ;;  %v591_v44 = vrot.slane %v572_v40, 4  ;;  %v571_v45 = vmax.f32 %v485_v41, 0.0  ;;  %v573_v46 = vmax.f32 %v562_v42, 0.0 }
 0x23c   :  { %v585_v47 = vrot.slane %v571_v45, 4  ;;  %v597_v48 = vrot.slane %v573_v46, 4  ;;  %v580_v49 = vadd.f32 %v579_v43, %v570_v39  ;;  %v592_v50 = vadd.f32 %v591_v44, %v572_v40 }
 0x23e   :  { %v586_v51 = vadd.f32 %v585_v47, %v571_v45  ;;  %v598_v52 = vadd.f32 %v597_v48, %v573_v46  ;;  %v581_v61 = vrot.slane %v580_v49, 2  ;;  %v593_v62 = vrot.slane %v592_v50, 2 }
 0x23f   :  { %v488_v53 = vpop.f32.mrf.mxu1  ;;  %v565_v54 = vpop.f32.mrf.mxu0 }
 0x240   :  { %v587_v55 = vrot.slane %v586_v51, 2  ;;  %v599_v56 = vrot.slane %v598_v52, 2  ;;  %v489_v57 = vadd.f32 %v488_v53, %v399_v29  ;;  %v566_v58 = vadd.f32 %v565_v54, %v407_v30 }
 0x241   :  { %v490_v59 = vpop.f32.mrf.mxu1  ;;  %v567_v60 = vpop.f32.mrf.mxu0  ;;  %v582_v10 = vadd.f32 %v581_v61, %v580_v49  ;;  %v594_v11 = vadd.f32 %v593_v62, %v592_v50 }
 0x242   :  { %v574_v63 = vmax.f32 %v489_v57, 0.0  ;;  %v576_v0 = vmax.f32 %v566_v58, 0.0  ;;  %v491_v1 = vadd.f32 %v490_v59, %v403_v31  ;;  %v568_v2 = vadd.f32 %v567_v60, %v411_v32 }
 0x243   :  { %v588_v3 = vadd.f32 %v587_v55, %v586_v51  ;;  %v600_v4 = vadd.f32 %v599_v56, %v598_v52  ;;  %v583_v25 = vrot.slane %v582_v10, 1  ;;  %v595_v26 = vrot.slane %v594_v11, 1 }
 0x244   :  { %v603_v5 = vrot.slane %v574_v63, 4  ;;  %v615_v6 = vrot.slane %v576_v0, 4  ;;  %v575_v9 = vmax.f32 %v491_v1, 0.0  ;;  %v577_v18 = vmax.f32 %v568_v2, 0.0 }
 0x245   :  { %v589_v16 = vrot.slane %v588_v3, 1  ;;  %v601_v20 = vrot.slane %v600_v4, 1  ;;  %v639_v32 = vunpack.c.0.s8 %v638_v19  ;;  %v584_v38 = vadd.f32 %v583_v25, %v582_v10 }
 0x246   :  { %v604_v12 = vadd.f32 %v603_v5, %v574_v63  ;;  %v616_v13 = vadd.f32 %v615_v6, %v576_v0  ;;  %v609_v14 = vrot.slane %v575_v9, 4  ;;  %v621_v15 = vrot.slane %v577_v18, 4 }
 0x247   :  { %v590_v31 = vadd.f32 %v589_v16, %v588_v3  ;;  %v602_v33 = vadd.f32 %v601_v20, %v600_v4  ;;  %v596_v39 = vadd.f32 %v595_v26, %v594_v11  ;;  %v642_v43 = vsub.s32 %v639_v32, %v906_v8 }
 0x248   :  { %v605_v21 = vrot.slane %v604_v12, 2  ;;  %v617_v22 = vrot.slane %v616_v13, 2  ;;  %v610_v23 = vadd.f32 %v609_v14, %v575_v9  ;;  %v622_v24 = vadd.f32 %v621_v15, %v577_v18 }
 0x249   :  { %v635_v42 = vcombine.low %v584_v38, %v590_v31  ;;  %v636_v44 = vcombine.low %v596_v39, %v602_v33  ;;  %v832_v51 = vmov 1966171168  }
 0x24a   :  { %v606_v27 = vadd.f32 %v605_v21, %v604_v12  ;;  %v618_v28 = vadd.f32 %v617_v22, %v616_v13  ;;  %v611_v29 = vrot.slane %v610_v23, 2  ;;  %v623_v30 = vrot.slane %v622_v24, 2 }
 0x24b   :  { %v692_v52 = vunpack.c.l.s4 %v832_v51  ;;  %v643_v53 = vrot.slane %v635_v42, %v642_v43  ;;  %v650_v54 = vrot.slane %v636_v44, %v642_v43 }
 0x24c   :  { %v607_v34 = vrot.slane %v606_v27, 1  ;;  %v619_v35 = vrot.slane %v618_v28, 1  ;;  %v612_v36 = vadd.f32 %v611_v29, %v610_v23  ;;  %v624_v37 = vadd.f32 %v623_v30, %v622_v24 }
 0x24d   :  { %v651_v58 = vcombine.low %v643_v53, %v650_v54  ;;  %v693_v60 = vunpack.c.0.s8 %v692_v52 }
 0x24e   :  { %v613_v40 = vrot.slane %v612_v36, 1  ;;  %v625_v41 = vrot.slane %v624_v37, 1  ;;  %v608_v45 = vadd.f32 %v607_v34, %v606_v27  ;;  %v620_v46 = vadd.f32 %v619_v35, %v618_v28 }
 0x24f   :  { %v696_v0 = vsub.s32 %v693_v60, %v906_v8 }
 0x250   :  { %v614_v47 = vadd.f32 %v613_v40, %v612_v36  ;;  %v626_v48 = vadd.f32 %v625_v41, %v624_v37 }
 0x252   :  { %v652_v49 = vcombine.low %v608_v45, %v614_v47  ;;  %v653_v50 = vcombine.low %v620_v46, %v626_v48 }
 0x254   :  { %v660_v55 = vrot.slane %v652_v49, %v642_v43  ;;  %v667_v56 = vrot.slane %v653_v50, %v642_v43 }
 0x256   :  { %v668_v57 = vcombine.low %v660_v55, %v667_v56 }
 0x258   :  { %v673_v59 = vrot.slane %v668_v57, 7 }
 0x25a   :  { %v675_v61 = vsel %vm674_vm0, %v673_v59, %v651_v58 }
 0x25b   :  { %v677_v62 = vsel %vm676_vm1, %v673_v59, %v675_v61 }
 0x25c   :  { %v679_v63 = vsel %vm678_vm2, %v673_v59, %v677_v62 }
 0x25d   :  { %v681_v1 = vsel %vm680_vm3, %v673_v59, %v679_v63 }
 0x25e   :  { %v689_v2 = vmul.f32 0.125, %v681_v1 }
 0x260   :  { %v697_v3 = vrot.slane %v689_v2, %v696_v0 }
 0x262   :  { %v698_v4 = vcombine.high %v697_v3, %v697_v3  ;;  %705 = vst.msk [vmem:[#allocation8] sm:$0xf] %vm703_vm4, %v697_v3 }
 0x264   :  { %706 = vst.msk [vmem:[#allocation8 + $0x4] sm:$0xf] %vm703_vm4, %v698_v4 }
 0x265   :  { %805 = shalt.err (!%p802_p0)
}
 0x266   :  { %s834_s29 = smov 64   ;;  %s835_s30 = smov 4  }
 0x267   :  { %718 = dma.vmem_to_hbm [thread:$0]  %s713_s27, 128, %s931_s7, [#allocation5], %s834_s29, %s834_s29, %s835_s30  }
 0x268   :  { %818 = dma.done.wait [#allocation5], 128  }
 0x269   :  { %819 = vsyncadd [#allocation5], 4294967168 }
 0x26a   :  { %722 = vsyncpa [#allocation4], 1 }
 0x26b   :  { %723 = vsyncpa [#allocation7], 1 }
 0x26c   :  { %724 = vsyncpa [#allocation5], 1 }

</bundles_post_ra>
